<compile_context>
chip_gen: v7x
topology: tpu7x:2x2x1
jax: 0.10.0
libtpu: 0.0.40
codegen_flags: <defaults>
</compile_context>

<pallas_src>
import functools

import jax
import jax.numpy as jnp
from jax.experimental import pallas as pl
from jax.experimental.pallas import tpu as pltpu


def _similarity_kernel(lvec_ref, rvec_ref, wh_mult_ref, wh_abs_ref, bh_ref,
                       wp_ref, bp_ref, out_ref):
    lvec = lvec_ref[...]
    rvec = rvec_ref[...]

    # Elementwise distance features (VPU) — no concat; each half feeds its own
    # MXU push accumulating into the same f32 result.
    mult_dist = lvec * rvec
    abs_dist = jnp.abs(lvec - rvec)

    h = jnp.dot(mult_dist, wh_mult_ref[...], preferred_element_type=jnp.float32)
    h = h + jnp.dot(abs_dist, wh_abs_ref[...], preferred_element_type=jnp.float32)
    h = jax.nn.sigmoid(h + bh_ref[...])                      # (tb, hidden)

    logits = jnp.dot(h, wp_ref[...], preferred_element_type=jnp.float32)
    logits = logits + bp_ref[...]                            # (tb, num_classes)

    # Numerically stable softmax over classes (exact divide so rows sum to 1).
    m = jnp.max(logits, axis=1, keepdims=True)
    e = jnp.exp(logits - m)
    denom = jnp.sum(e, axis=1, keepdims=True)
    out_ref[...] = (e / denom).astype(out_ref.dtype)


def prepare_params(wh_w, wh_b, wp_w, wp_b):
    """One-time parameter prep (hoisted out of the per-call path).

    wh_w: (hidden, 2*mem_dim), wh_b: (hidden,)   (PyTorch nn.Linear layout)
    wp_w: (num_classes, hidden), wp_b: (num_classes,)
    Returns weights pre-transposed to [in, out] with Wh split into its
    mult/abs halves, and biases reshaped to 2-D rows.
    """
    hidden_dim, mem2 = wh_w.shape
    mem_dim = mem2 // 2
    wh_mult_t = jnp.asarray(wh_w[:, :mem_dim].T)    # (mem_dim, hidden)
    wh_abs_t = jnp.asarray(wh_w[:, mem_dim:].T)     # (mem_dim, hidden)
    bh = wh_b.reshape(1, hidden_dim)
    wp_t = jnp.asarray(wp_w.T)                      # (hidden, num_classes)
    bp = wp_b.reshape(1, wp_w.shape[0])
    return wh_mult_t, wh_abs_t, bh, wp_t, bp


def _pick_batch_tile(B):
    # Largest clean tile that divides B; fall back to a single full block.
    for t in (1024, 512, 256, 128, 64, 32, 16, 8):
        if B % t == 0:
            return t
    return B  # full-extent block is always layout-legal


@functools.partial(jax.jit, static_argnames=())
def similarity_forward(lvec, rvec, wh_mult_t, wh_abs_t, bh, wp_t, bp):
    """lvec, rvec: (B, mem_dim) f32.  Weights pre-transposed via prepare_params."""
    B, mem_dim = lvec.shape
    hidden_dim = wh_mult_t.shape[1]
    num_classes = wp_t.shape[1]

    tb = _pick_batch_tile(B)
    grid = (B // tb,)

    # Batch tiles stream; weights/biases use constant index_maps so they stay
    # pinned in VMEM across the whole grid.
    # TODO(synk): output last dim = num_classes (5) triggers masked stores; a
    # caller that tolerates padding to 128 lanes would store faster at scale.
    return pl.pallas_call(
        _similarity_kernel,
        out_shape=jax.ShapeDtypeStruct((B, num_classes), jnp.float32),
        grid=grid,
        in_specs=[
            pl.BlockSpec((tb, mem_dim), lambda i: (i, 0)),
            pl.BlockSpec((tb, mem_dim), lambda i: (i, 0)),
            pl.BlockSpec((mem_dim, hidden_dim), lambda i: (0, 0)),
            pl.BlockSpec((mem_dim, hidden_dim), lambda i: (0, 0)),
            pl.BlockSpec((1, hidden_dim), lambda i: (0, 0)),
            pl.BlockSpec((hidden_dim, num_classes), lambda i: (0, 0)),
            pl.BlockSpec((1, num_classes), lambda i: (0, 0)),
        ],
        out_specs=pl.BlockSpec((tb, num_classes), lambda i: (i, 0)),
        compiler_params=pltpu.CompilerParams(
            dimension_semantics=("parallel",)),
    )(lvec, rvec, wh_mult_t, wh_abs_t, bh, wp_t, bp)


def _reference(lvec, rvec, wh_w, wh_b, wp_w, wp_b):
    mult_dist = lvec * rvec
    abs_dist = jnp.abs(lvec - rvec)
    vec_dist = jnp.concatenate([mult_dist, abs_dist], axis=1)
    h = jax.nn.sigmoid(vec_dist @ wh_w.T + wh_b)
    return jax.nn.softmax(h @ wp_w.T + wp_b, axis=1)


if __name__ == "__main__":
    key = jax.random.PRNGKey(0)
    B, mem_dim, hidden_dim, num_classes = 128, 32, 16, 5

    k1, k2, k3, k4, k5, k6 = jax.random.split(key, 6)
    lvec = jax.random.normal(k1, (B, mem_dim), dtype=jnp.float32)
    rvec = jax.random.normal(k2, (B, mem_dim), dtype=jnp.float32)
    # Deterministic parameter init (synthetic; matches nn.Linear shapes).
    wh_w = jax.random.normal(k3, (hidden_dim, 2 * mem_dim), dtype=jnp.float32) * 0.1
    wh_b = jax.random.normal(k4, (hidden_dim,), dtype=jnp.float32) * 0.1
    wp_w = jax.random.normal(k5, (num_classes, hidden_dim), dtype=jnp.float32) * 0.1
    wp_b = jax.random.normal(k6, (num_classes,), dtype=jnp.float32) * 0.1

    # Hoisted one-time prep (transpose / split / reshape).
    params = prepare_params(wh_w, wh_b, wp_w, wp_b)

    out = similarity_forward(lvec, rvec, *params)
    out = jax.block_until_ready(out)

    ref = _reference(lvec, rvec, wh_w, wh_b, wp_w, wp_b)
    assert out.shape == (B, num_classes)
    assert jnp.allclose(out, ref, atol=1e-4, rtol=1e-4), "mismatch vs reference"
    assert jnp.allclose(jnp.sum(out, axis=1), 1.0, atol=1e-4), "softmax rows must sum to 1"

    print("KERNEL_OK")
</pallas_src>

<mosaic_0001>
module attributes {stable_mosaic.version = 11 : i64} {
  func.func @_similarity_kernel(%arg0: i32, %arg1: memref<128x32xf32, #tpu.memory_space<vmem>>, %arg2: memref<128x32xf32, #tpu.memory_space<vmem>>, %arg3: memref<32x16xf32, #tpu.memory_space<vmem>>, %arg4: memref<32x16xf32, #tpu.memory_space<vmem>>, %arg5: memref<1x16xf32, #tpu.memory_space<vmem>>, %arg6: memref<16x5xf32, #tpu.memory_space<vmem>>, %arg7: memref<1x5xf32, #tpu.memory_space<vmem>>, %arg8: memref<128x5xf32, #tpu.memory_space<vmem>>) attributes {dimension_semantics = [#tpu.dimension_semantics<parallel>], iteration_bounds = array<i64: 1>, scalar_prefetch = 0 : i64, scratch_operands = 0 : i64, tpu.core_type = #tpu.core_type<tc>, window_params = [{transform_indices = @transform_0, window_bounds = array<i64: 128, 32>}, {transform_indices = @transform_1, window_bounds = array<i64: 128, 32>}, {pipeline_mode = #tpu.pipeline_mode<synchronous>, transform_indices = @transform_2, window_bounds = array<i64: 32, 16>}, {pipeline_mode = #tpu.pipeline_mode<synchronous>, transform_indices = @transform_3, window_bounds = array<i64: 32, 16>}, {pipeline_mode = #tpu.pipeline_mode<synchronous>, transform_indices = @transform_4, window_bounds = array<i64: 1, 16>}, {pipeline_mode = #tpu.pipeline_mode<synchronous>, transform_indices = @transform_5, window_bounds = array<i64: 16, 5>}, {pipeline_mode = #tpu.pipeline_mode<synchronous>, transform_indices = @transform_6, window_bounds = array<i64: 1, 5>}, {transform_indices = @transform_7, window_bounds = array<i64: 128, 5>}]} {
    %c0 = arith.constant 0 : index
    %c0_0 = arith.constant 0 : index
    %0 = vector.load %arg1[%c0, %c0_0] : memref<128x32xf32, #tpu.memory_space<vmem>>, vector<128x32xf32>
    %c0_1 = arith.constant 0 : index
    %c0_2 = arith.constant 0 : index
    %1 = vector.load %arg2[%c0_1, %c0_2] : memref<128x32xf32, #tpu.memory_space<vmem>>, vector<128x32xf32>
    %2 = arith.mulf %0, %1 : vector<128x32xf32>
    %3 = arith.subf %0, %1 : vector<128x32xf32>
    %4 = math.absf %3 : vector<128x32xf32>
    %c0_3 = arith.constant 0 : index
    %c0_4 = arith.constant 0 : index
    %5 = vector.load %arg3[%c0_3, %c0_4] : memref<32x16xf32, #tpu.memory_space<vmem>>, vector<32x16xf32>
    %cst = arith.constant dense<0.000000e+00> : vector<128x16xf32>
    %6 = tpu.matmul %2, %5, %cst {dimension_numbers = #tpu.dot_dimension_numbers<[1], [0], [0], [1], [0, 0, 1, 1], [], []>} : vector<128x32xf32>, vector<32x16xf32>, vector<128x16xf32> -> vector<128x16xf32>
    %c0_5 = arith.constant 0 : index
    %c0_6 = arith.constant 0 : index
    %7 = vector.load %arg4[%c0_5, %c0_6] : memref<32x16xf32, #tpu.memory_space<vmem>>, vector<32x16xf32>
    %cst_7 = arith.constant dense<0.000000e+00> : vector<128x16xf32>
    %8 = tpu.matmul %4, %7, %cst_7 {dimension_numbers = #tpu.dot_dimension_numbers<[1], [0], [0], [1], [0, 0, 1, 1], [], []>} : vector<128x32xf32>, vector<32x16xf32>, vector<128x16xf32> -> vector<128x16xf32>
    %9 = arith.addf %6, %8 : vector<128x16xf32>
    %c0_8 = arith.constant 0 : index
    %c0_9 = arith.constant 0 : index
    %10 = vector.load %arg5[%c0_8, %c0_9] : memref<1x16xf32, #tpu.memory_space<vmem>>, vector<1x16xf32>
    %11 = vector.broadcast %10 : vector<1x16xf32> to vector<128x16xf32>
    %12 = arith.addf %9, %11 : vector<128x16xf32>
    %13 = arith.negf %12 : vector<128x16xf32>
    %14 = math.exp %13 : vector<128x16xf32>
    %cst_10 = arith.constant 1.000000e+00 : f32
    %15 = vector.broadcast %cst_10 : f32 to vector<128x16xf32>
    %16 = arith.addf %15, %14 : vector<128x16xf32>
    %17 = arith.divf %15, %16 : vector<128x16xf32>
    %c0_11 = arith.constant 0 : index
    %c0_12 = arith.constant 0 : index
    %18 = vector.load %arg6[%c0_11, %c0_12] : memref<16x5xf32, #tpu.memory_space<vmem>>, vector<16x5xf32>
    %cst_13 = arith.constant dense<0.000000e+00> : vector<128x5xf32>
    %19 = tpu.matmul %17, %18, %cst_13 {dimension_numbers = #tpu.dot_dimension_numbers<[1], [0], [0], [1], [0, 0, 1, 1], [], []>} : vector<128x16xf32>, vector<16x5xf32>, vector<128x5xf32> -> vector<128x5xf32>
    %c0_14 = arith.constant 0 : index
    %c0_15 = arith.constant 0 : index
    %20 = vector.load %arg7[%c0_14, %c0_15] : memref<1x5xf32, #tpu.memory_space<vmem>>, vector<1x5xf32>
    %21 = vector.broadcast %20 : vector<1x5xf32> to vector<128x5xf32>
    %22 = arith.addf %19, %21 : vector<128x5xf32>
    %cst_16 = arith.constant dense<0xFF800000> : vector<128xf32>
    %23 = vector.multi_reduction <maximumf>, %22, %cst_16 [1] : vector<128x5xf32> to vector<128xf32>
    %24 = vector.shape_cast %23 : vector<128xf32> to vector<128x1xf32>
    %25 = vector.broadcast %24 : vector<128x1xf32> to vector<128x5xf32>
    %26 = arith.subf %22, %25 : vector<128x5xf32>
    %27 = math.exp %26 : vector<128x5xf32>
    %cst_17 = arith.constant dense<0.000000e+00> : vector<128xf32>
    %28 = vector.multi_reduction <add>, %27, %cst_17 [1] : vector<128x5xf32> to vector<128xf32>
    %29 = vector.shape_cast %28 : vector<128xf32> to vector<128x1xf32>
    %30 = vector.broadcast %29 : vector<128x1xf32> to vector<128x5xf32>
    %31 = arith.divf %27, %30 : vector<128x5xf32>
    %c0_18 = arith.constant 0 : index
    %c0_19 = arith.constant 0 : index
    %32 = vector.load %arg8[%c0_18, %c0_19] : memref<128x5xf32, #tpu.memory_space<vmem>>, vector<128x5xf32>
    tpu.vector_store %arg8[%c0_18, %c0_19], %31 {strides = array<i32>} : memref<128x5xf32, #tpu.memory_space<vmem>>, vector<128x5xf32>,
    return
  }
  func.func @transform_0(%arg0: i32) -> (i32, i32) {
    %c0_i32 = arith.constant 0 : i32
    %c0_i32_0 = arith.constant 0 : i32
    return %arg0, %c0_i32 : i32, i32
  }
  func.func @transform_1(%arg0: i32) -> (i32, i32) {
    %c0_i32 = arith.constant 0 : i32
    %c0_i32_0 = arith.constant 0 : i32
    return %arg0, %c0_i32 : i32, i32
  }
  func.func @transform_2(%arg0: i32) -> (i32, i32) {
    %c0_i32 = arith.constant 0 : i32
    %c0_i32_0 = arith.constant 0 : i32
    %c0_i32_1 = arith.constant 0 : i32
    return %c0_i32, %c0_i32_0 : i32, i32
  }
  func.func @transform_3(%arg0: i32) -> (i32, i32) {
    %c0_i32 = arith.constant 0 : i32
    %c0_i32_0 = arith.constant 0 : i32
    %c0_i32_1 = arith.constant 0 : i32
    return %c0_i32, %c0_i32_0 : i32, i32
  }
  func.func @transform_4(%arg0: i32) -> (i32, i32) {
    %c0_i32 = arith.constant 0 : i32
    %c0_i32_0 = arith.constant 0 : i32
    %c0_i32_1 = arith.constant 0 : i32
    return %c0_i32, %c0_i32_0 : i32, i32
  }
  func.func @transform_5(%arg0: i32) -> (i32, i32) {
    %c0_i32 = arith.constant 0 : i32
    %c0_i32_0 = arith.constant 0 : i32
    %c0_i32_1 = arith.constant 0 : i32
    return %c0_i32, %c0_i32_0 : i32, i32
  }
  func.func @transform_6(%arg0: i32) -> (i32, i32) {
    %c0_i32 = arith.constant 0 : i32
    %c0_i32_0 = arith.constant 0 : i32
    %c0_i32_1 = arith.constant 0 : i32
    return %c0_i32, %c0_i32_0 : i32, i32
  }
  func.func @transform_7(%arg0: i32) -> (i32, i32) {
    %c0_i32 = arith.constant 0 : i32
    %c0_i32_0 = arith.constant 0 : i32
    return %arg0, %c0_i32 : i32, i32
  }
}

</mosaic_0001>

<bundles_post_ra>
// kernel: similarity_forward.1
= control target key start
LH: loop header
LB: loop body
LE: loop exit
PB: predicated region body
PF: predicated region fallthrough
CT: control target
= control target key end

     0   :  { %vm114_vm0 = vcmask 261120   ;;  %vm629_vm1 = vcmask 130048   ;;  %vm823_vm2 = vcmask 39936   ;;  %s1982_s3 = inlined_call_operand.vmem [shape: f32[32,16], index: 3, kind: input, shape index: {}]   ;;  %s1983_s0 = inlined_call_operand.vmem [shape: f32[128,32], index: 0, kind: input, shape index: {}]   ;;  %s1984_s1 = inlined_call_operand.vmem [shape: f32[128,32], index: 1, kind: input, shape index: {}]   ;;  %s1985_s2 = inlined_call_operand.vmem [shape: f32[32,16], index: 2, kind: input, shape index: {}]   ;;  %s1986_s5 = inlined_call_operand.vmem [shape: f32[16,5], index: 5, kind: input, shape index: {}]   ;;  %s1987_s4 = inlined_call_operand.vmem [shape: f32[1,16], index: 4, kind: input, shape index: {}]   ;;  %s1988_s6 = inlined_call_operand.vmem [shape: f32[1,5], index: 6, kind: input, shape index: {}]   ;;  %s1989_s7 = inlined_call_operand.vmem [shape: f32[128,5], index: 7, kind: output, shape index: {}]  }
   0x1   :  { %v110_v0 = vld [vmem:[%s1982_s3] sm:$0xff]  ;;  %v111_v1 = vld [vmem:[%s1982_s3 + $0x8] sm:$0xff]  ;;  %v112_v2 = vld [vmem:[%s1982_s3 + $0x10] sm:$0xff] }
   0x2   :  { %v1236_v3 = vpack.c.bf16 %v111_v1, %v110_v0  ;;  %v113_v4 = vld [vmem:[%s1982_s3 + $0x18] sm:$0xff]  ;;  %v1459_v5 = vld [vmem:[%s1983_s0] sm:$0xff]  ;;  %v1471_v9 = vld [vmem:[%s1983_s0 + $0x8] sm:$0xff] }
   0x3   :  { %v1464_v6 = vld [vmem:[%s1984_s1] sm:$0xff]  ;;  %v1240_v7 = vpack.c.bf16 %v113_v4, %v112_v2  ;;  %v1476_v10 = vld [vmem:[%s1984_s1 + $0x8] sm:$0xff]  ;;  %v1489_v14 = vld [vmem:[%s1983_s0 + $0x10] sm:$0xff] }
   0x4   :  { %v74_v8 = vsub.f32 %v1459_v5, %v1464_v6  ;;  %v106_v11 = vld [vmem:[%s1985_s2] sm:$0xff]  ;;  %1237 = vmatprep.subr.bf16.mxu0 %v1236_v3  ;;  %v75_v12 = vsub.f32 %v1471_v9, %v1476_v10  ;;  %v107_v13 = vld [vmem:[%s1985_s2 + $0x8] sm:$0xff]  ;;  %v1494_v15 = vld [vmem:[%s1984_s1 + $0x10] sm:$0xff]  ;;  %1256 = vmatprep.subr.bf16.mxu1 %v1236_v3 }
   0x5   :  { %1239 = vmatpush3.bf16.msra.mxu0 %v1236_v3  ;;  %v76_v17 = vsub.f32 %v1489_v14, %v1494_v15  ;;  %v1501_v18 = vld [vmem:[%s1983_s0 + $0x18] sm:$0xff]  ;;  %v1511_v20 = vld [vmem:[%s1983_s0 + $0x20] sm:$0xff]  ;;  %1258 = vmatpush3.bf16.msra.mxu1 %v1236_v3  ;;  %v1244_v21 = vpack.c.bf16 %v107_v13, %v106_v11  ;;  %v108_v25 = vld [vmem:[%s1985_s2 + $0x10] sm:$0xff] }
   0x6   :  { %v90_v16 = vand.u32 2147483647, %v74_v8  ;;  %v1506_v19 = vld [vmem:[%s1984_s1 + $0x18] sm:$0xff]  ;;  %1241 = vmatprep.subr.bf16.mxu0 %v1240_v7  ;;  %v1518_v23 = vld [vmem:[%s1984_s1 + $0x20] sm:$0xff]  ;;  %1257 = vmatprep.subr.bf16.mxu1 %v1240_v7  ;;  %v91_v27 = vand.u32 2147483647, %v75_v12 }
   0x7   :  { %v77_v22 = vsub.f32 %v1501_v18, %v1506_v19  ;;  %v78_v24 = vsub.f32 %v1511_v20, %v1518_v23  ;;  %v109_v26 = vld [vmem:[%s1985_s2 + $0x18] sm:$0xff]  ;;  %v1532_v28 = vld [vmem:[%s1983_s0 + $0x28] sm:$0xff]  ;;  %v1542_v30 = vld [vmem:[%s1983_s0 + $0x30] sm:$0xff]  ;;  %v92_v31 = vand.u32 2147483647, %v76_v17  ;;  %v58_v17 = vmul.f32 %v1464_v6, %v1459_v5 }
   0x8   :  { %1152 = vmatprep.mubr.msk.f32.mxu0 %vm114_vm0, %v90_v16  ;;  %v1537_v29 = vld [vmem:[%s1984_s1 + $0x28] sm:$0xff]  ;;  %v1547_v32 = vld [vmem:[%s1984_s1 + $0x30] sm:$0xff]  ;;  %v1552_v33 = vld [vmem:[%s1983_s0 + $0x40] sm:$0xff]  ;;  %v1248_v36 = vpack.c.bf16 %v109_v26, %v108_v25  ;;  %v61_v5 = vmul.f32 %v1506_v19, %v1501_v18  ;;  %v62_v6 = vmul.f32 %v1518_v23, %v1511_v20 }
   0x9   :  { %1243 = vmatpush3.bf16.msra.mxu0 %v1240_v7  ;;  %1259 = vmatpush3.bf16.msra.mxu1 %v1240_v7  ;;  %v1557_v34 = vld [vmem:[%s1984_s1 + $0x40] sm:$0xff]  ;;  %v93_v35 = vand.u32 2147483647, %v77_v22  ;;  %v1564_v38 = vld [vmem:[%s1983_s0 + $0x48] sm:$0xff]  ;;  %v1574_v40 = vld [vmem:[%s1983_s0 + $0x50] sm:$0xff]  ;;  %v79_v47 = vsub.f32 %v1532_v28, %v1537_v29  ;;  %v80_v53 = vsub.f32 %v1542_v30, %v1547_v32  ;;  %v59_v22 = vmul.f32 %v1476_v10, %v1471_v9 }
   0xa   :  { %1245 = vmatprep.subr.bf16.mxu0 %v1244_v21  ;;  %v82_v37 = vsub.f32 %v1552_v33, %v1557_v34  ;;  %v1569_v39 = vld [vmem:[%s1984_s1 + $0x48] sm:$0xff]  ;;  %v94_v41 = vand.u32 2147483647, %v78_v24  ;;  %v1579_v42 = vld [vmem:[%s1983_s0 + $0x38] sm:$0xff]  ;;  %v1591_v45 = vld [vmem:[%s1984_s1 + $0x50] sm:$0xff]  ;;  %v60_v24 = vmul.f32 %v1494_v15, %v1489_v14  ;;  %v63_v9 = vmul.f32 %v1537_v29, %v1532_v28 }
   0xb   :  { %v1584_v43 = vld [vmem:[%s1984_s1 + $0x38] sm:$0xff]  ;;  %v83_v44 = vsub.f32 %v1564_v38, %v1569_v39  ;;  %v84_v49 = vsub.f32 %v1574_v40, %v1591_v45  ;;  %v1611_v51 = vld [vmem:[%s1983_s0 + $0x60] sm:$0xff]  ;;  %v39_v57 = vld [vmem:[%s1983_s0 + $0x68] sm:$0xff]  ;;  %v95_v0 = vand.u32 2147483647, %v79_v47  ;;  %v64_v10 = vmul.f32 %v1547_v32, %v1542_v30 }
   0xc   :  { %v1596_v46 = vld [vmem:[%s1983_s0 + $0x58] sm:$0xff]  ;;  %1153 = vmatmul.mubr.msk.f32.vlgmr.msra.gmra.mrb[0].mxu0 %vm114_vm0, %v91_v27  ;;  %v98_v48 = vand.u32 2147483647, %v82_v37  ;;  %v1616_v52 = vld [vmem:[%s1984_s1 + $0x60] sm:$0xff]  ;;  %v55_v58 = vld [vmem:[%s1984_s1 + $0x68] sm:$0xff]  ;;  %v81_v1 = vsub.f32 %v1579_v42, %v1584_v43  ;;  %v65_v14 = vmul.f32 %v1584_v43, %v1579_v42  ;;  %v66_v15 = vmul.f32 %v1557_v34, %v1552_v33 }
   0xd   :  { %v1606_v50 = vld [vmem:[%s1984_s1 + $0x58] sm:$0xff]  ;;  %1247 = vmatpush3.bf16.msra.mxu0 %v1244_v21  ;;  %1155 = vmatprep.mubr.msk.f32.mxu0 %vm114_vm0, %v92_v31  ;;  %v99_v54 = vand.u32 2147483647, %v83_v44  ;;  %v86_v56 = vsub.f32 %v1611_v51, %v1616_v52  ;;  %v40_v59 = vld [vmem:[%s1983_s0 + $0x70] sm:$0xff]  ;;  %v100_v60 = vand.u32 2147483647, %v84_v49  ;;  %v87_v63 = vsub.f32 %v39_v57, %v55_v58 }
   0xe   :  { %v85_v55 = vsub.f32 %v1596_v46, %v1606_v50  ;;  %1249 = vmatprep.subr.bf16.mxu0 %v1248_v36  ;;  %1164 = vmatprep.mubr.msk.f32.mxu1 %vm114_vm0, %v98_v48  ;;  %v56_v61 = vld [vmem:[%s1984_s1 + $0x70] sm:$0xff]  ;;  %v41_v4 = vld [vmem:[%s1983_s0 + $0x78] sm:$0xff]  ;;  %v96_v8 = vand.u32 2147483647, %v80_v53  ;;  %v97_v13 = vand.u32 2147483647, %v81_v1  ;;  %v67_v18 = vmul.f32 %v1569_v39, %v1564_v38 }
   0xf   :  { %1165 = vmatmul.mubr.msk.f32.vlgmr.msra.gmra.mrb[0].mxu1 %vm114_vm0, %v99_v54  ;;  %v102_v2 = vand.u32 2147483647, %v86_v56  ;;  %v88_v3 = vsub.f32 %v40_v59, %v56_v61  ;;  %v57_v7 = vld [vmem:[%s1984_s1 + $0x78] sm:$0xff]  ;;  %v103_v11 = vand.u32 2147483647, %v87_v63  ;;  %v68_v19 = vmul.f32 %v1591_v45, %v1574_v40  ;;  %v620_v28 = vld [vmem:[%s1986_s5] sm:$0xff] }
  0x10   :  { %v101_v62 = vand.u32 2147483647, %v85_v55  ;;  %1156 = vmatmul.mubr.msk.f32.gmra.mrb[2].mxu0 %vm114_vm0, %v93_v35  ;;  %1167 = vmatprep.mubr.msk.f32.mxu1 %vm114_vm0, %v100_v60  ;;  %v89_v12 = vsub.f32 %v41_v4, %v57_v7  ;;  %v69_v20 = vmul.f32 %v1606_v50, %v1596_v46  ;;  %v70_v23 = vmul.f32 %v1616_v52, %v1611_v51  ;;  %v621_v29 = vld [vmem:[%s1986_s5 + $0x8] sm:$0xff]  ;;  %v1713_v37 = vld [vmem:[%s1987_s4] ss:$0 sm:$0xff] }
  0x11   :  { %1158 = vmatprep.mubr.msk.f32.mxu0 %vm114_vm0, %v94_v41  ;;  %1251 = vmatpush3.bf16.msra.mxu0 %v1248_v36  ;;  %v104_v16 = vand.u32 2147483647, %v88_v3  ;;  %v71_v25 = vmul.f32 %v55_v58, %v39_v57  ;;  %v72_v26 = vmul.f32 %v56_v61, %v40_v59  ;;  %v73_v27 = vmul.f32 %v57_v7, %v41_v4 }
  0x12   :  { %v105_v21 = vand.u32 2147483647, %v89_v12  ;;  %v1252_v30 = vpack.c.bf16 %v621_v29, %v620_v28 }
  0x13   :  { %1168 = vmatmul.mubr.msk.f32.gmra.mrb[2].mxu1 %vm114_vm0, %v101_v62 }
  0x14   :  { %1159 = vmatmul.mubr.msk.f32.gmra.mrb[4].mxu0 %vm114_vm0, %v95_v0  ;;  %1170 = vmatprep.mubr.msk.f32.mxu1 %vm114_vm0, %v102_v2 }
  0x15   :  { %1161 = vmatprep.mubr.msk.f32.mxu0 %vm114_vm0, %v96_v8  ;;  %1253 = vmatprep.subr.bf16.mxu1 %v1252_v30 }
  0x16   :  { %1255 = vmatpush3.bf16.msra.mxu1 %v1252_v30 }
  0x17   :  { %1171 = vmatmul.mubr.msk.f32.gmra.mrb[4].mxu1 %vm114_vm0, %v103_v11 }
  0x18   :  { %1162 = vmatmul.mubr.msk.f32.gmra.mrb[6].mxu0 %vm114_vm0, %v97_v13  ;;  %1173 = vmatprep.mubr.msk.f32.mxu1 %vm114_vm0, %v104_v16 }
  0x19   :  { %1184 = vmatprep.mubr.msk.f32.mxu0 %vm114_vm0, %v58_v17 }
  0x1b   :  { %1174 = vmatmul.mubr.msk.f32.gmra.mrb[6].mxu1 %vm114_vm0, %v105_v21 }
  0x1c   :  { %1185 = vmatmul.mubr.msk.f32.vlgmr.msra.gmra.mrb[0].mxu0 %vm114_vm0, %v59_v22 }
  0x1d   :  { %1187 = vmatprep.mubr.msk.f32.mxu0 %vm114_vm0, %v60_v24 }
  0x20   :  { %1188 = vmatmul.mubr.msk.f32.gmra.mrb[2].mxu0 %vm114_vm0, %v61_v5 }
  0x21   :  { %1190 = vmatprep.mubr.msk.f32.mxu0 %vm114_vm0, %v62_v6 }
  0x24   :  { %1191 = vmatmul.mubr.msk.f32.gmra.mrb[4].mxu0 %vm114_vm0, %v63_v9 }
  0x25   :  { %1193 = vmatprep.mubr.msk.f32.mxu0 %vm114_vm0, %v64_v10 }
  0x28   :  { %1194 = vmatmul.mubr.msk.f32.gmra.mrb[6].mxu0 %vm114_vm0, %v65_v14 }
  0x29   :  { %1196 = vmatprep.mubr.msk.f32.mxu0 %vm114_vm0, %v66_v15 }
  0x2c   :  { %1197 = vmatmul.mubr.msk.f32.gmra.mrb[8].mxu0 %vm114_vm0, %v67_v18 }
  0x2d   :  { %1199 = vmatprep.mubr.msk.f32.mxu0 %vm114_vm0, %v68_v19 }
  0x30   :  { %1200 = vmatmul.mubr.msk.f32.gmra.mrb[10].mxu0 %vm114_vm0, %v69_v20 }
  0x31   :  { %1202 = vmatprep.mubr.msk.f32.mxu0 %vm114_vm0, %v70_v23 }
  0x34   :  { %1203 = vmatmul.mubr.msk.f32.gmra.mrb[12].mxu0 %vm114_vm0, %v71_v25 }
  0x35   :  { %1205 = vmatprep.mubr.msk.f32.mxu0 %vm114_vm0, %v72_v26 }
  0x38   :  { %1206 = vmatmul.mubr.msk.f32.gmra.mrb[14].mxu0 %vm114_vm0, %v73_v27 }
  0xe2   :  { %v1166_v31 = vpop.f32.mrb[0].mxu1 }
  0xe3   :  { %v269_v32 = vpop.f32.mrb[1].mxu1 }
  0xe6   :  { %v1169_v33 = vpop.f32.mrb[2].mxu1 }
  0xe7   :  { %v279_v34 = vpop.f32.mrb[3].mxu1 }
  0xea   :  { %v1706_v35 = vpop.f32.mrb[4].mxu1 }
  0xeb   :  { %v1708_v36 = vpop.f32.mrb[5].mxu1 }
  0xee   :  { %v1715_v38 = vpop.f32.mrb[6].mxu1 }
  0xef   :  { %v1186_v39 = vpop.f32.mrb[0].mxu0  ;;  %v1717_v40 = vpop.f32.mrb[7].mxu1 }
  0xf0   :  { %v509_v41 = vadd.f32 %v1186_v39, %v1713_v37  ;;  %v422_v42 = vpop.f32.mrb[1].mxu0 }
  0xf1   :  { %v508_v43 = vadd.f32 %v1713_v37, %v422_v42 }
  0xf2   :  { %v1054_v44 = vmul.f32 -1.442695, %v509_v41 }
  0xf3   :  { %v1053_v45 = vmul.f32 -1.442695, %v508_v43  ;;  %v1189_v46 = vpop.f32.mrb[2].mxu0 }
  0xf4   :  { %1276 = vpow2.f32 %v1054_v44  ;;  %v511_v47 = vadd.f32 %v1189_v46, %v1713_v37  ;;  %v432_v48 = vpop.f32.mrb[3].mxu0 }
  0xf5   :  { %1278 = vpow2.f32 %v1053_v45  ;;  %v510_v49 = vadd.f32 %v1713_v37, %v432_v48 }
  0xf6   :  { %v1056_v50 = vmul.f32 -1.442695, %v511_v47 }
  0xf7   :  { %v1055_v51 = vmul.f32 -1.442695, %v510_v49  ;;  %v1192_v52 = vpop.f32.mrb[4].mxu0 }
  0xf8   :  { %1280 = vpow2.f32 %v1056_v50  ;;  %v513_v53 = vadd.f32 %v1192_v52, %v1713_v37  ;;  %v442_v54 = vpop.f32.mrb[5].mxu0 }
  0xf9   :  { %1282 = vpow2.f32 %v1055_v51  ;;  %v512_v55 = vadd.f32 %v1713_v37, %v442_v54 }
  0xfa   :  { %v1058_v56 = vmul.f32 -1.442695, %v513_v53 }
  0xfb   :  { %v1057_v57 = vmul.f32 -1.442695, %v512_v55  ;;  %v1195_v58 = vpop.f32.mrb[6].mxu0 }
  0xfc   :  { %1284 = vpow2.f32 %v1058_v56  ;;  %v515_v59 = vadd.f32 %v1195_v58, %v1713_v37  ;;  %v452_v60 = vpop.f32.mrb[7].mxu0 }
  0xfd   :  { %1286 = vpow2.f32 %v1057_v57  ;;  %v514_v61 = vadd.f32 %v1713_v37, %v452_v60 }
  0xfe   :  { %v1277_v62 = vpop.eup %1276  ;;  %v1060_v63 = vmul.f32 -1.442695, %v515_v59 }
  0xff   :  { %v1279_v0 = vpop.eup %1278  ;;  %v573_v1 = vadd.f32 1.0, %v1277_v62  ;;  %v1059_v2 = vmul.f32 -1.442695, %v514_v61  ;;  %v1198_v3 = vpop.f32.mrb[8].mxu0 }
 0x100   :  { %v572_v4 = vadd.f32 1.0, %v1279_v0  ;;  %1288 = vpow2.f32 %v1060_v63  ;;  %v468_v7 = vadd.f32 %v1198_v3, %v1166_v31  ;;  %v462_v8 = vpop.f32.mrb[9].mxu0 }
 0x101   :  { %1290 = vrcp.f32 %v573_v1  ;;  %v463_v11 = vadd.f32 %v462_v8, %v269_v32 }
 0x102   :  { %v1281_v12 = vpop.eup %1280  ;;  %1292 = vrcp.f32 %v572_v4  ;;  %v517_v13 = vadd.f32 %v1713_v37, %v468_v7 }
 0x103   :  { %v1283_v16 = vpop.eup %1282  ;;  %v575_v17 = vadd.f32 1.0, %v1281_v12  ;;  %1294 = vpow2.f32 %v1059_v2  ;;  %v516_v21 = vadd.f32 %v1713_v37, %v463_v11  ;;  %v1201_v22 = vpop.f32.mrb[10].mxu0 }
 0x104   :  { %v574_v24 = vadd.f32 1.0, %v1283_v16  ;;  %v1062_v5 = vmul.f32 -1.442695, %v517_v13  ;;  %v478_v6 = vadd.f32 %v1201_v22, %v1169_v33  ;;  %v472_v9 = vpop.f32.mrb[11].mxu0 }
 0x105   :  { %1296 = vrcp.f32 %v575_v17  ;;  %v1061_v10 = vmul.f32 -1.442695, %v516_v21  ;;  %v473_v14 = vadd.f32 %v472_v9, %v279_v34 }
 0x106   :  { %v1285_v15 = vpop.eup %1284  ;;  %1298 = vrcp.f32 %v574_v24  ;;  %v519_v18 = vadd.f32 %v1713_v37, %v478_v6  ;;  %v1069_v6 = vld [vmem:[%s1988_s6] ss:$0 sm:$0xff] }
 0x107   :  { %v1287_v19 = vpop.eup %1286  ;;  %v577_v20 = vadd.f32 1.0, %v1285_v15  ;;  %1300 = vpow2.f32 %v1062_v5  ;;  %v518_v23 = vadd.f32 %v1713_v37, %v473_v14  ;;  %v1204_v25 = vpop.f32.mrb[12].mxu0 }
 0x108   :  { %v576_v26 = vadd.f32 1.0, %v1287_v19  ;;  %1302 = vpow2.f32 %v1061_v10  ;;  %v1064_v27 = vmul.f32 -1.442695, %v519_v18  ;;  %v488_v28 = vadd.f32 %v1204_v25, %v1706_v35  ;;  %v482_v29 = vpop.f32.mrb[13].mxu0 }
 0x109   :  { %1304 = vrcp.f32 %v577_v20  ;;  %v1063_v30 = vmul.f32 -1.442695, %v518_v23  ;;  %v483_v31 = vadd.f32 %v482_v29, %v1708_v36 }
 0x10a   :  { %v1289_v32 = vpop.eup %1288  ;;  %1306 = vrcp.f32 %v576_v26  ;;  %v521_v33 = vadd.f32 %v1713_v37, %v488_v28 }
 0x10b   :  { %v1291_v34 = vpop.eup %1290  ;;  %1308 = vpow2.f32 %v1064_v27  ;;  %v520_v39 = vadd.f32 %v1713_v37, %v483_v31  ;;  %v1207_v41 = vpop.f32.mrb[14].mxu0  ;;  %v579_v46 = vadd.f32 1.0, %v1289_v32 }
 0x10c   :  { %v1293_v42 = vpop.eup %1292  ;;  %1310 = vpow2.f32 %v1063_v30  ;;  %v1066_v43 = vmul.f32 -1.442695, %v521_v33  ;;  %v498_v35 = vadd.f32 %v1207_v41, %v1715_v38  ;;  %v492_v44 = vpop.f32.mrb[15].mxu0 }
 0x10d   :  { %v1295_v45 = vpop.eup %1294  ;;  %v1065_v47 = vmul.f32 -1.442695, %v520_v39  ;;  %v493_v36 = vadd.f32 %v492_v44, %v1717_v40  ;;  %1212 = vmatprep.mubr.msk.f32.mxu1 %vm629_vm1, %v1293_v42 }
 0x10e   :  { %v578_v48 = vadd.f32 1.0, %v1295_v45  ;;  %1312 = vpow2.f32 %v1066_v43  ;;  %v523_v49 = vadd.f32 %v1713_v37, %v498_v35  ;;  %1213 = vmatmul.mubr.msk.f32.vlgmr.msra.gmra.mrb[8].mxu1 %vm629_vm1, %v1291_v34 }
 0x10f   :  { %v1297_v50 = vpop.eup %1296  ;;  %1314 = vpow2.f32 %v1065_v47  ;;  %v522_v51 = vadd.f32 %v1713_v37, %v493_v36 }
 0x110   :  { %v1299_v52 = vpop.eup %1298  ;;  %1316 = vrcp.f32 %v578_v48  ;;  %v1068_v38 = vmul.f32 -1.442695, %v523_v49 }
 0x111   :  { %v1301_v53 = vpop.eup %1300  ;;  %1318 = vrcp.f32 %v579_v46  ;;  %v1067_v54 = vmul.f32 -1.442695, %v522_v51  ;;  %1215 = vmatprep.mubr.msk.f32.mxu1 %vm629_vm1, %v1299_v52 }
 0x112   :  { %v1303_v40 = vpop.eup %1302  ;;  %v581_v55 = vadd.f32 1.0, %v1301_v53  ;;  %1320 = vpow2.f32 %v1068_v38  ;;  %1216 = vmatmul.mubr.msk.f32.gmra.mrb[10].mxu1 %vm629_vm1, %v1297_v50 }
 0x113   :  { %v1305_v56 = vpop.eup %1304  ;;  %v580_v57 = vadd.f32 1.0, %v1303_v40  ;;  %1322 = vpow2.f32 %v1067_v54 }
 0x114   :  { %v1307_v58 = vpop.eup %1306  ;;  %1324 = vrcp.f32 %v581_v55 }
 0x115   :  { %v1309_v59 = vpop.eup %1308  ;;  %1326 = vrcp.f32 %v580_v57  ;;  %1218 = vmatprep.mubr.msk.f32.mxu1 %vm629_vm1, %v1307_v58 }
 0x116   :  { %v1311_v37 = vpop.eup %1310  ;;  %v583_v60 = vadd.f32 1.0, %v1309_v59  ;;  %1219 = vmatmul.mubr.msk.f32.gmra.mrb[12].mxu1 %vm629_vm1, %v1305_v56 }
 0x117   :  { %v582_v61 = vadd.f32 1.0, %v1311_v37 }
 0x118   :  { %v1313_v62 = vpop.eup %1312  ;;  %1328 = vrcp.f32 %v583_v60 }
 0x119   :  { %v1315_v63 = vpop.eup %1314  ;;  %1330 = vrcp.f32 %v582_v61  ;;  %v585_v0 = vadd.f32 1.0, %v1313_v62 }
 0x11a   :  { %v1317_v1 = vpop.eup %1316  ;;  %v584_v2 = vadd.f32 1.0, %v1315_v63 }
 0x11b   :  { %v1319_v3 = vpop.eup %1318  ;;  %1332 = vrcp.f32 %v585_v0  ;;  %1221 = vmatprep.mubr.msk.f32.mxu1 %vm629_vm1, %v1317_v1 }
 0x11c   :  { %v1321_v4 = vpop.eup %1320  ;;  %1334 = vrcp.f32 %v584_v2  ;;  %1222 = vmatmul.mubr.msk.f32.gmra.mrb[14].mxu1 %vm629_vm1, %v1319_v3 }
 0x11d   :  { %v1323_v7 = vpop.eup %1322  ;;  %v587_v8 = vadd.f32 1.0, %v1321_v4 }
 0x11e   :  { %v1325_v11 = vpop.eup %1324  ;;  %v586_v12 = vadd.f32 1.0, %v1323_v7 }
 0x11f   :  { %v1327_v13 = vpop.eup %1326  ;;  %1336 = vrcp.f32 %v587_v8 }
 0x120   :  { %1338 = vrcp.f32 %v586_v12  ;;  %1224 = vmatprep.mubr.msk.f32.mxu1 %vm629_vm1, %v1327_v13 }
 0x121   :  { %1225 = vmatmul.mubr.msk.f32.gmra.mrb[16].mxu1 %vm629_vm1, %v1325_v11 }
 0x122   :  { %v1329_v16 = vpop.eup %1328 }
 0x123   :  { %v1331_v17 = vpop.eup %1330 }
 0x124   :  { %1227 = vmatprep.mubr.msk.f32.mxu1 %vm629_vm1, %v1331_v17 }
 0x125   :  { %v1333_v21 = vpop.eup %1332  ;;  %1228 = vmatmul.mubr.msk.f32.gmra.mrb[18].mxu1 %vm629_vm1, %v1329_v16 }
 0x126   :  { %v1335_v22 = vpop.eup %1334 }
 0x127   :  { %1230 = vmatprep.mubr.msk.f32.mxu1 %vm629_vm1, %v1335_v22 }
 0x129   :  { %v1337_v24 = vpop.eup %1336  ;;  %1231 = vmatmul.mubr.msk.f32.gmra.mrb[20].mxu1 %vm629_vm1, %v1333_v21 }
 0x12a   :  { %v1339_v5 = vpop.eup %1338 }
 0x12b   :  { %1233 = vmatprep.mubr.msk.f32.mxu1 %vm629_vm1, %v1339_v5 }
 0x12d   :  { %1234 = vmatmul.mubr.msk.f32.gmra.mrb[22].mxu1 %vm629_vm1, %v1337_v24 }
 0x1e1   :  { %v1214_v9 = vpop.f32.mrb[8].mxu1 }
 0x1e2   :  { %v1758_v10 = vadd.f32 %v1214_v9, %v1069_v6  ;;  %v744_v14 = vpop.f32.mrb[9].mxu1 }
 0x1e3   :  { %v1760_v15 = vadd.f32 %v1069_v6, %v744_v14 }
 0x1e4   :  { %v827_v18 = vsel %vm823_vm2, %v1758_v10, -inf }
 0x1e5   :  { %828 = vmax.xlane.f32.xlu0 %v827_v18  ;;  %v1217_v19 = vpop.f32.mrb[10].mxu1  ;;  %v824_v26 = vsel %vm823_vm2, %v1760_v15, -inf }
 0x1e6   :  { %v1764_v20 = vadd.f32 %v1217_v19, %v1069_v6  ;;  %v754_v23 = vpop.f32.mrb[11].mxu1 }
 0x1e7   :  { %v1766_v25 = vadd.f32 %v1069_v6, %v754_v23 }
 0x1e8   :  { %v833_v27 = vsel %vm823_vm2, %v1764_v20, -inf }
 0x1e9   :  { %825 = vmax.xlane.f32.xlu0 %v824_v26  ;;  %834 = vmax.xlane.f32.xlu1 %v833_v27  ;;  %v1220_v28 = vpop.f32.mrb[12].mxu1  ;;  %v830_v32 = vsel %vm823_vm2, %v1766_v25, -inf }
 0x1ea   :  { %v764_v29 = vpop.f32.mrb[13].mxu1  ;;  %v1774_v31 = vadd.f32 %v1220_v28, %v1069_v6 }
 0x1eb   :  { %v1772_v30 = vadd.f32 %v1069_v6, %v764_v29 }
 0x1ec   :  { %v839_v42 = vsel %vm823_vm2, %v1774_v31, -inf }
 0x1ed   :  { %831 = vmax.xlane.f32.xlu1 %v830_v32  ;;  %v836_v33 = vsel %vm823_vm2, %v1772_v30, -inf }
 0x1ee   :  { %837 = vmax.xlane.f32.xlu0 %v836_v33 }
 0x1ef   :  { %v1223_v34 = vpop.f32.mrb[14].mxu1 }
 0x1f0   :  { %v1780_v39 = vadd.f32 %v1223_v34, %v1069_v6  ;;  %v774_v41 = vpop.f32.mrb[15].mxu1 }
 0x1f1   :  { %v1784_v43 = vadd.f32 %v1069_v6, %v774_v41  ;;  %840 = vmax.xlane.f32.xlu1 %v839_v42 }
 0x1f2   :  { %v845_v45 = vsel %vm823_vm2, %v1780_v39, -inf }
 0x1f3   :  { %v842_v35 = vsel %vm823_vm2, %v1784_v43, -inf }
 0x1f4   :  { %843 = vmax.xlane.f32.xlu0 %v842_v35  ;;  %v1226_v44 = vpop.f32.mrb[16].mxu1 }
 0x1f5   :  { %v1790_v46 = vadd.f32 %v1226_v44, %v1069_v6  ;;  %v784_v47 = vpop.f32.mrb[17].mxu1  ;;  %846 = vmax.xlane.f32.xlu1 %v845_v45 }
 0x1f6   :  { %v1792_v36 = vadd.f32 %v1069_v6, %v784_v47 }
 0x1f7   :  { %v851_v50 = vsel %vm823_vm2, %v1790_v46, -inf }
 0x1f8   :  { %v1229_v48 = vpop.f32.mrb[18].mxu1  ;;  %v848_v49 = vsel %vm823_vm2, %v1792_v36, -inf }
 0x1f9   :  { %v1798_v51 = vadd.f32 %v1229_v48, %v1069_v6  ;;  %v794_v52 = vpop.f32.mrb[19].mxu1  ;;  %849 = vmax.xlane.f32.xlu0 %v848_v49  ;;  %852 = vmax.xlane.f32.xlu1 %v851_v50 }
 0x1fa   :  { %v1800_v38 = vadd.f32 %v1069_v6, %v794_v52 }
 0x1fb   :  { %v857_v40 = vsel %vm823_vm2, %v1798_v51, -inf }
 0x1fc   :  { %v1232_v53 = vpop.f32.mrb[20].mxu1  ;;  %v854_v54 = vsel %vm823_vm2, %v1800_v38, -inf }
 0x1fd   :  { %v1806_v55 = vadd.f32 %v1232_v53, %v1069_v6  ;;  %v804_v56 = vpop.f32.mrb[21].mxu1  ;;  %855 = vmax.xlane.f32.xlu0 %v854_v54  ;;  %858 = vmax.xlane.f32.xlu1 %v857_v40 }
 0x1fe   :  { %v1808_v57 = vadd.f32 %v1069_v6, %v804_v56 }
 0x1ff   :  { %v863_v37 = vsel %vm823_vm2, %v1806_v55, -inf }
 0x200   :  { %v1235_v58 = vpop.f32.mrb[22].mxu1  ;;  %v860_v59 = vsel %vm823_vm2, %v1808_v57, -inf }
 0x201   :  { %v1814_v60 = vadd.f32 %v1235_v58, %v1069_v6  ;;  %v814_v61 = vpop.f32.mrb[23].mxu1  ;;  %861 = vmax.xlane.f32.xlu0 %v860_v59  ;;  %864 = vmax.xlane.f32.xlu1 %v863_v37 }
 0x202   :  { %v1816_v62 = vadd.f32 %v1069_v6, %v814_v61 }
 0x203   :  { %v869_v0 = vsel %vm823_vm2, %v1814_v60, -inf }
 0x204   :  { %v866_v63 = vsel %vm823_vm2, %v1816_v62, -inf }
 0x205   :  { %867 = vmax.xlane.f32.xlu0 %v866_v63  ;;  %870 = vmax.xlane.f32.xlu1 %v869_v0 }
 0x272   :  { %v829_v1 = vpop.xlane.xlu0 %828 }
 0x273   :  { %v873_v2 = vsub.f32 %v1758_v10, %v829_v1 }
 0x275   :  { %v890_v3 = vmul.f32 1.442695, %v873_v2 }
 0x276   :  { %v826_v4 = vpop.xlane.xlu0 %825  ;;  %v835_v7 = vpop.xlane.xlu1 %834 }
 0x277   :  { %1340 = vpow2.f32 %v890_v3  ;;  %v872_v8 = vsub.f32 %v1760_v15, %v826_v4  ;;  %v875_v11 = vsub.f32 %v1764_v20, %v835_v7 }
 0x279   :  { %v888_v12 = vmul.f32 1.442695, %v872_v8  ;;  %v894_v13 = vmul.f32 1.442695, %v875_v11 }
 0x27a   :  { %v832_v16 = vpop.xlane.xlu1 %831 }
 0x27b   :  { %1342 = vpow2.f32 %v888_v12  ;;  %v874_v17 = vsub.f32 %v1766_v25, %v832_v16  ;;  %v838_v21 = vpop.xlane.xlu0 %837 }
 0x27c   :  { %1344 = vpow2.f32 %v894_v13  ;;  %v876_v22 = vsub.f32 %v1772_v30, %v838_v21 }
 0x27d   :  { %v892_v24 = vmul.f32 1.442695, %v874_v17 }
 0x27e   :  { %v896_v5 = vmul.f32 1.442695, %v876_v22  ;;  %v841_v6 = vpop.xlane.xlu1 %840 }
 0x27f   :  { %1346 = vpow2.f32 %v892_v24  ;;  %v877_v9 = vsub.f32 %v1774_v31, %v841_v6 }
 0x280   :  { %1348 = vpow2.f32 %v896_v5 }
 0x281   :  { %v1828_v10 = vpop.eup %1340  ;;  %v898_v14 = vmul.f32 1.442695, %v877_v9  ;;  %v844_v15 = vpop.xlane.xlu0 %843 }
 0x282   :  { %v878_v18 = vsub.f32 %v1784_v43, %v844_v15  ;;  %v847_v19 = vpop.xlane.xlu1 %846  ;;  %v923_v20 = vsel %vm823_vm2, %v1828_v10, 0.0 }
 0x283   :  { %1350 = vpow2.f32 %v898_v14  ;;  %v879_v23 = vsub.f32 %v1780_v39, %v847_v19  ;;  %924 = vadd.xlane.f32.xlu1 %v923_v20 }
 0x284   :  { %v900_v25 = vmul.f32 1.442695, %v878_v18 }
 0x285   :  { %v1834_v26 = vpop.eup %1342  ;;  %v902_v27 = vmul.f32 1.442695, %v879_v23 }
 0x286   :  { %v1836_v28 = vpop.eup %1344  ;;  %1352 = vpow2.f32 %v900_v25  ;;  %v850_v29 = vpop.xlane.xlu0 %849  ;;  %v920_v31 = vsel %vm823_vm2, %v1834_v26, 0.0 }
 0x287   :  { %v853_v30 = vpop.xlane.xlu1 %852  ;;  %1354 = vpow2.f32 %v902_v27  ;;  %v880_v32 = vsub.f32 %v1792_v36, %v850_v29  ;;  %v929_v34 = vsel %vm823_vm2, %v1836_v28, 0.0  ;;  %921 = vadd.xlane.f32.xlu0 %v920_v31 }
 0x288   :  { %v881_v33 = vsub.f32 %v1790_v46, %v853_v30  ;;  %930 = vadd.xlane.f32.xlu1 %v929_v34 }
 0x289   :  { %v1844_v39 = vpop.eup %1346  ;;  %v904_v41 = vmul.f32 1.442695, %v880_v32 }
 0x28a   :  { %v906_v42 = vmul.f32 1.442695, %v881_v33  ;;  %v856_v43 = vpop.xlane.xlu0 %855  ;;  %v926_v44 = vsel %vm823_vm2, %v1844_v39, 0.0  ;;  %v1848_v45 = vpop.eup %1348 }
 0x28b   :  { %v859_v35 = vpop.xlane.xlu1 %858  ;;  %1356 = vpow2.f32 %v904_v41  ;;  %v882_v47 = vsub.f32 %v1800_v38, %v856_v43  ;;  %927 = vadd.xlane.f32.xlu0 %v926_v44  ;;  %v932_v54 = vsel %vm823_vm2, %v1848_v45, 0.0 }
 0x28c   :  { %v883_v46 = vsub.f32 %v1798_v51, %v859_v35  ;;  %1358 = vpow2.f32 %v906_v42 }
 0x28d   :  { %v1852_v36 = vpop.eup %1350  ;;  %v908_v48 = vmul.f32 1.442695, %v882_v47 }
 0x28e   :  { %v910_v49 = vmul.f32 1.442695, %v883_v46  ;;  %v862_v50 = vpop.xlane.xlu0 %861  ;;  %v935_v53 = vsel %vm823_vm2, %v1852_v36, 0.0 }
 0x28f   :  { %v865_v52 = vpop.xlane.xlu1 %864  ;;  %1360 = vpow2.f32 %v908_v48  ;;  %v884_v40 = vsub.f32 %v1808_v57, %v862_v50  ;;  %936 = vadd.xlane.f32.xlu1 %v935_v53  ;;  %933 = vadd.xlane.f32.xlu0 %v932_v54 }
 0x290   :  { %v885_v38 = vsub.f32 %v1806_v55, %v865_v52  ;;  %v1860_v51 = vpop.eup %1352  ;;  %1362 = vpow2.f32 %v910_v49 }
 0x291   :  { %v1862_v56 = vpop.eup %1354  ;;  %v912_v58 = vmul.f32 1.442695, %v884_v40  ;;  %v938_v0 = vsel %vm823_vm2, %v1860_v51, 0.0 }
 0x292   :  { %v914_v59 = vmul.f32 1.442695, %v885_v38  ;;  %v868_v37 = vpop.xlane.xlu0 %867  ;;  %v941_v63 = vsel %vm823_vm2, %v1862_v56, 0.0 }
 0x293   :  { %v871_v61 = vpop.xlane.xlu1 %870  ;;  %1364 = vpow2.f32 %v912_v58  ;;  %v886_v55 = vsub.f32 %v1816_v62, %v868_v37  ;;  %942 = vadd.xlane.f32.xlu1 %v941_v63  ;;  %939 = vadd.xlane.f32.xlu0 %v938_v0 }
 0x294   :  { %v887_v57 = vsub.f32 %v1814_v60, %v871_v61  ;;  %1366 = vpow2.f32 %v914_v59 }
 0x295   :  { %v1870_v1 = vpop.eup %1356  ;;  %v916_v2 = vmul.f32 1.442695, %v886_v55 }
 0x296   :  { %v918_v3 = vmul.f32 1.442695, %v887_v57  ;;  %v1872_v4 = vpop.eup %1358  ;;  %v944_v7 = vsel %vm823_vm2, %v1870_v1, 0.0 }
 0x297   :  { %1368 = vpow2.f32 %v916_v2  ;;  %v947_v8 = vsel %vm823_vm2, %v1872_v4, 0.0  ;;  %945 = vadd.xlane.f32.xlu0 %v944_v7 }
 0x298   :  { %1370 = vpow2.f32 %v918_v3  ;;  %948 = vadd.xlane.f32.xlu1 %v947_v8 }
 0x299   :  { %v1878_v60 = vpop.eup %1360 }
 0x29a   :  { %v1880_v62 = vpop.eup %1362  ;;  %v950_v11 = vsel %vm823_vm2, %v1878_v60, 0.0 }
 0x29b   :  { %v953_v12 = vsel %vm823_vm2, %v1880_v62, 0.0  ;;  %951 = vadd.xlane.f32.xlu0 %v950_v11 }
 0x29c   :  { %954 = vadd.xlane.f32.xlu1 %v953_v12 }
 0x29d   :  { %v1886_v13 = vpop.eup %1364 }
 0x29e   :  { %v1888_v16 = vpop.eup %1366  ;;  %v956_v17 = vsel %vm823_vm2, %v1886_v13, 0.0 }
 0x29f   :  { %v959_v21 = vsel %vm823_vm2, %v1888_v16, 0.0  ;;  %957 = vadd.xlane.f32.xlu0 %v956_v17 }
 0x2a0   :  { %960 = vadd.xlane.f32.xlu1 %v959_v21 }
 0x2a1   :  { %v1894_v22 = vpop.eup %1368 }
 0x2a2   :  { %v1896_v24 = vpop.eup %1370  ;;  %v962_v5 = vsel %vm823_vm2, %v1894_v22, 0.0 }
 0x2a3   :  { %v965_v6 = vsel %vm823_vm2, %v1896_v24, 0.0  ;;  %963 = vadd.xlane.f32.xlu0 %v962_v5 }
 0x2a4   :  { %966 = vadd.xlane.f32.xlu1 %v965_v6 }
 0x310   :  { %v925_v9 = vpop.xlane.xlu1 %924 }
 0x311   :  { %1372 = vrcp.f32 %v925_v9 }
 0x314   :  { %v922_v14 = vpop.xlane.xlu0 %921 }
 0x315   :  { %v931_v15 = vpop.xlane.xlu1 %930  ;;  %1374 = vrcp.f32 %v922_v14 }
 0x316   :  { %1376 = vrcp.f32 %v931_v15 }
 0x318   :  { %v928_v18 = vpop.xlane.xlu0 %927 }
 0x319   :  { %1378 = vrcp.f32 %v928_v18 }
 0x31b   :  { %v1373_v19 = vpop.eup %1372 }
 0x31c   :  { %v971_v20 = vmul.f32 %v1373_v19, %v1828_v10  ;;  %v937_v23 = vpop.xlane.xlu1 %936  ;;  %v934_v25 = vpop.xlane.xlu0 %933 }
 0x31d   :  { %1380 = vrcp.f32 %v937_v23 }
 0x31e   :  { %1001 = vst.msk [vmem:[%s1989_s7 + $0x8] sm:$0xff] %vm823_vm2, %v971_v20  ;;  %1382 = vrcp.f32 %v934_v25 }
 0x31f   :  { %v1375_v27 = vpop.eup %1374 }
 0x320   :  { %v1377_v29 = vpop.eup %1376  ;;  %v969_v30 = vmul.f32 %v1375_v27, %v1834_v26  ;;  %v943_v31 = vpop.xlane.xlu1 %942 }
 0x321   :  { %v940_v32 = vpop.xlane.xlu0 %939  ;;  %v975_v33 = vmul.f32 %v1377_v29, %v1836_v28  ;;  %1384 = vrcp.f32 %v943_v31 }
 0x322   :  { %1000 = vst.msk [vmem:[%s1989_s7] sm:$0xff] %vm823_vm2, %v969_v30  ;;  %1386 = vrcp.f32 %v940_v32 }
 0x323   :  { %v1379_v10 = vpop.eup %1378  ;;  %1003 = vst.msk [vmem:[%s1989_s7 + $0x18] sm:$0xff] %vm823_vm2, %v975_v33 }
 0x324   :  { %v973_v34 = vmul.f32 %v1379_v10, %v1844_v39 }
 0x325   :  { %v946_v26 = vpop.xlane.xlu0 %945  ;;  %v949_v41 = vpop.xlane.xlu1 %948 }
 0x326   :  { %1388 = vrcp.f32 %v946_v26  ;;  %1002 = vst.msk [vmem:[%s1989_s7 + $0x10] sm:$0xff] %vm823_vm2, %v973_v34 }
 0x327   :  { %1390 = vrcp.f32 %v949_v41  ;;  %v1381_v28 = vpop.eup %1380 }
 0x328   :  { %v1383_v42 = vpop.eup %1382  ;;  %v979_v43 = vmul.f32 %v1381_v28, %v1852_v36 }
 0x329   :  { %v952_v35 = vpop.xlane.xlu0 %951  ;;  %v977_v44 = vmul.f32 %v1383_v42, %v1848_v45  ;;  %v955_v47 = vpop.xlane.xlu1 %954 }
 0x32a   :  { %1392 = vrcp.f32 %v952_v35  ;;  %1005 = vst.msk [vmem:[%s1989_s7 + $0x28] sm:$0xff] %vm823_vm2, %v979_v43 }
 0x32b   :  { %1394 = vrcp.f32 %v955_v47  ;;  %v1385_v39 = vpop.eup %1384  ;;  %1004 = vst.msk [vmem:[%s1989_s7 + $0x20] sm:$0xff] %vm823_vm2, %v977_v44 }
 0x32c   :  { %v1387_v46 = vpop.eup %1386  ;;  %v983_v36 = vmul.f32 %v1385_v39, %v1862_v56 }
 0x32d   :  { %v958_v48 = vpop.xlane.xlu0 %957  ;;  %v981_v45 = vmul.f32 %v1387_v46, %v1860_v51  ;;  %v961_v49 = vpop.xlane.xlu1 %960 }
 0x32e   :  { %1396 = vrcp.f32 %v958_v48  ;;  %1007 = vst.msk [vmem:[%s1989_s7 + $0x38] sm:$0xff] %vm823_vm2, %v983_v36 }
 0x32f   :  { %1398 = vrcp.f32 %v961_v49  ;;  %1006 = vst.msk [vmem:[%s1989_s7 + $0x30] sm:$0xff] %vm823_vm2, %v981_v45 }
 0x330   :  { %v1389_v50 = vpop.eup %1388 }
 0x331   :  { %v1391_v52 = vpop.eup %1390  ;;  %v985_v53 = vmul.f32 %v1389_v50, %v1870_v1  ;;  %v964_v54 = vpop.xlane.xlu0 %963 }
 0x332   :  { %v987_v40 = vmul.f32 %v1391_v52, %v1872_v4  ;;  %v967_v38 = vpop.xlane.xlu1 %966  ;;  %1400 = vrcp.f32 %v964_v54 }
 0x333   :  { %1008 = vst.msk [vmem:[%s1989_s7 + $0x40] sm:$0xff] %vm823_vm2, %v985_v53  ;;  %1402 = vrcp.f32 %v967_v38 }
 0x334   :  { %v1393_v51 = vpop.eup %1392  ;;  %1009 = vst.msk [vmem:[%s1989_s7 + $0x48] sm:$0xff] %vm823_vm2, %v987_v40 }
 0x335   :  { %v1395_v56 = vpop.eup %1394  ;;  %v989_v58 = vmul.f32 %v1393_v51, %v1878_v60 }
 0x336   :  { %v991_v59 = vmul.f32 %v1395_v56, %v1880_v62 }
 0x337   :  { %1010 = vst.msk [vmem:[%s1989_s7 + $0x50] sm:$0xff] %vm823_vm2, %v989_v58 }
 0x338   :  { %v1397_v37 = vpop.eup %1396  ;;  %1011 = vst.msk [vmem:[%s1989_s7 + $0x58] sm:$0xff] %vm823_vm2, %v991_v59 }
 0x339   :  { %v1399_v61 = vpop.eup %1398  ;;  %v993_v63 = vmul.f32 %v1397_v37, %v1886_v13 }
 0x33a   :  { %v995_v0 = vmul.f32 %v1399_v61, %v1888_v16 }
 0x33b   :  { %1012 = vst.msk [vmem:[%s1989_s7 + $0x60] sm:$0xff] %vm823_vm2, %v993_v63 }
 0x33c   :  { %v1401_v55 = vpop.eup %1400  ;;  %1013 = vst.msk [vmem:[%s1989_s7 + $0x68] sm:$0xff] %vm823_vm2, %v995_v0 }
 0x33d   :  { %v1403_v57 = vpop.eup %1402  ;;  %v997_v1 = vmul.f32 %v1401_v55, %v1894_v22 }
 0x33e   :  { %v999_v2 = vmul.f32 %v1403_v57, %v1896_v24 }
 0x33f   :  { %1014 = vst.msk [vmem:[%s1989_s7 + $0x70] sm:$0xff] %vm823_vm2, %v997_v1 }
 0x340   :  { %1015 = vst.msk [vmem:[%s1989_s7 + $0x78] sm:$0xff] %vm823_vm2, %v999_v2 }

</bundles_post_ra>
